<compile_context>
chip_gen: v6e
topology: v6e:2x2x1
jax: 0.10.0
libtpu: 0.0.40
codegen_flags: <defaults>
</compile_context>

<pallas_src>
import functools

import jax
import jax.numpy as jnp
from jax.experimental import pallas as pl
from jax.experimental.pallas import tpu as pltpu


def _nce_kernel(logits_ref, labels_ref, weight_ref, out_ref, *, num_classes: int):
    x = logits_ref[...].astype(jnp.float32)           # (T, C) cast in-kernel
    labels = labels_ref[...]                           # (T, 1) int32
    w = weight_ref[...].astype(jnp.float32)            # (1, C)

    # log-sum-exp over the class axis (axis=1)
    m = jnp.max(x, axis=1, keepdims=True)               # (T, 1)
    z = x - m                                            # (T, C)
    lse = jnp.log(jnp.sum(jnp.exp(z), axis=1, keepdims=True))   # (T, 1)

    # Select the label column without materializing score / float one_hot.
    is_y = jax.lax.broadcasted_iota(jnp.int32, x.shape, 1) == labels   # (T, C) bool
    z_y = jnp.sum(jnp.where(is_y, z, jnp.float32(0.0)), axis=1, keepdims=True)          # (T, 1)
    w_y = jnp.sum(jnp.where(is_y, jnp.broadcast_to(w, x.shape), jnp.float32(0.0)),
                  axis=1, keepdims=True)                                                 # (T, 1)

    # num = -w[y] * score[:, y] = w[y] * (lse - z[:, y])
    num = w_y * (lse - z_y)
    # den = -sum(score) = C*lse - sum(z)   (algebraic, no score materialization)
    den = jnp.float32(num_classes) * lse - jnp.sum(z, axis=1, keepdims=True)

    out_ref[...] = num / den                             # (T, 1) per-row NCE


def _round_up(v: int, m: int) -> int:
    return ((v + m - 1) // m) * m


def normalized_cross_entropy(logits, labels, cls_weight=None, *,
                             scale: float = 1.0, reduction: str = "mean"):
    """logits: (N, C) float, labels: (N,) int, cls_weight: (C,) float or None."""
    if reduction not in ("mean", "sum"):
        raise ValueError(f"reduction must be 'mean' or 'sum', got {reduction!r}")

    n, c = logits.shape
    labels2d = labels.reshape(n, 1).astype(jnp.int32)
    if cls_weight is None:
        cls_weight = jnp.ones((c,), dtype=jnp.float32)
    weight2d = cls_weight.reshape(1, c).astype(jnp.float32)

    itemsize = jnp.dtype(logits.dtype).itemsize
    # Sublane packing: f32 -> 8 rows, bf16 -> 16, int8/fp8 -> 32.
    sublane = max(8, 8 * (4 // max(itemsize, 1)))

    # Generation-aware VMEM budget for the logits block (double-buffered by
    # BlockSpec) plus the f32 per-tile intermediates.
    try:
        vmem_cap = int(pltpu.get_tpu_info().vmem_capacity_bytes)
    except Exception:  # no device / older API — assume v5e/v6e class
        vmem_cap = 128 * 1024 * 1024
    if vmem_cap <= 80 * 1024 * 1024:           # v7x-class (64 MiB per TC)
        block_bytes = 2 * 1024 * 1024
        vmem_limit = 32 * 1024 * 1024
    else:                                       # v5e / v6e (128 MiB)
        block_bytes = 4 * 1024 * 1024
        vmem_limit = 48 * 1024 * 1024

    rows_cap = max(sublane,
                   (block_bytes // max(c * itemsize, 1)) // sublane * sublane)
    tile_n = n if n <= rows_cap else rows_cap   # full-dim block is always legal
    grid_n = pl.cdiv(n, tile_n)

    kernel = functools.partial(_nce_kernel, num_classes=c)

    nce_rows = pl.pallas_call(
        kernel,
        out_shape=jax.ShapeDtypeStruct((n, 1), jnp.float32),
        grid_spec=pltpu.PrefetchScalarGridSpec(
            num_scalar_prefetch=0,
            grid=(grid_n,),
            in_specs=[
                pl.BlockSpec((tile_n, c), lambda i: (i, 0)),   # logits tile (native dtype)
                pl.BlockSpec((tile_n, 1), lambda i: (i, 0)),   # labels tile
                pl.BlockSpec((1, c), lambda i: (0, 0)),        # class weight (resident)
            ],
            out_specs=pl.BlockSpec((tile_n, 1), lambda i: (i, 0)),  # per-row NCE
        ),
        compiler_params=pltpu.CompilerParams(
            dimension_semantics=("parallel",),    # independent row tiles (2 TCs on v7x)
            vmem_limit_bytes=vmem_limit,
        ),
    )(logits, labels2d, weight2d)

    nce = nce_rows[:, 0]
    red = jnp.mean(nce) if reduction == "mean" else jnp.sum(nce)
    return jnp.float32(scale) * red


def _reference(logits, labels, cls_weight, *, scale=1.0, reduction="mean"):
    score = jax.nn.log_softmax(logits.astype(jnp.float32), axis=1)
    one_hot = jax.nn.one_hot(labels, logits.shape[1], dtype=jnp.float32)
    nce = -jnp.sum(one_hot * score, axis=1) / -jnp.sum(score, axis=1)
    nce = nce * cls_weight[labels]
    red = jnp.mean(nce) if reduction == "mean" else jnp.sum(nce)
    return scale * red


if __name__ == "__main__":
    key = jax.random.PRNGKey(0)
    N, C = 8, 16
    k1, k2 = jax.random.split(key)
    logits = jax.random.normal(k1, (N, C), dtype=jnp.float32)
    labels = jax.random.randint(k2, (N,), 0, C, dtype=jnp.int32)
    # WeightAttachment with weight=None behaves as identity -> per-class ones.
    cls_weight = jnp.ones((C,), dtype=jnp.float32)

    loss = normalized_cross_entropy(logits, labels, cls_weight,
                                    scale=1.0, reduction="mean")
    loss = jax.block_until_ready(loss)

    ref = _reference(logits, labels, cls_weight, scale=1.0, reduction="mean")
    assert jnp.allclose(loss, ref, rtol=1e-5, atol=1e-5), (loss, ref)
    print("KERNEL_OK")
</pallas_src>

<mosaic_0001>
module attributes {stable_mosaic.version = 11 : i64} {
  func.func @_nce_kernel(%arg0: i32, %arg1: memref<8x16xf32, #tpu.memory_space<vmem>>, %arg2: memref<8x1xi32, #tpu.memory_space<vmem>>, %arg3: memref<1x16xf32, #tpu.memory_space<vmem>>, %arg4: memref<8x1xf32, #tpu.memory_space<vmem>>) attributes {dimension_semantics = [#tpu.dimension_semantics<parallel>], iteration_bounds = array<i64: 1>, scalar_prefetch = 0 : i64, scratch_operands = 0 : i64, tpu.core_type = #tpu.core_type<tc>, window_params = [{transform_indices = @transform_0, window_bounds = array<i64: 8, 16>}, {transform_indices = @transform_1, window_bounds = array<i64: 8, 1>}, {pipeline_mode = #tpu.pipeline_mode<synchronous>, transform_indices = @transform_2, window_bounds = array<i64: 1, 16>}, {transform_indices = @transform_3, window_bounds = array<i64: 8, 1>}]} {
    %c0 = arith.constant 0 : index
    %c0_0 = arith.constant 0 : index
    %0 = vector.load %arg1[%c0, %c0_0] : memref<8x16xf32, #tpu.memory_space<vmem>>, vector<8x16xf32>
    %c0_1 = arith.constant 0 : index
    %c0_2 = arith.constant 0 : index
    %1 = vector.load %arg2[%c0_1, %c0_2] : memref<8x1xi32, #tpu.memory_space<vmem>>, vector<8x1xi32>
    %c0_3 = arith.constant 0 : index
    %c0_4 = arith.constant 0 : index
    %2 = vector.load %arg3[%c0_3, %c0_4] : memref<1x16xf32, #tpu.memory_space<vmem>>, vector<1x16xf32>
    %cst = arith.constant dense<0xFF800000> : vector<8xf32>
    %3 = vector.multi_reduction <maximumf>, %0, %cst [1] : vector<8x16xf32> to vector<8xf32>
    %4 = vector.shape_cast %3 : vector<8xf32> to vector<8x1xf32>
    %5 = vector.broadcast %4 : vector<8x1xf32> to vector<8x16xf32>
    %6 = arith.subf %0, %5 : vector<8x16xf32>
    %7 = math.exp %6 : vector<8x16xf32>
    %cst_5 = arith.constant dense<0.000000e+00> : vector<8xf32>
    %8 = vector.multi_reduction <add>, %7, %cst_5 [1] : vector<8x16xf32> to vector<8xf32>
    %9 = vector.shape_cast %8 : vector<8xf32> to vector<8x1xf32>
    %10 = math.log %9 : vector<8x1xf32>
    %11 = tpu.iota {dimensions = array<i32: 1>} : vector<8x16xi32>
    %12 = vector.broadcast %1 : vector<8x1xi32> to vector<8x16xi32>
    %13 = arith.cmpi eq, %11, %12 : vector<8x16xi32>
    %cst_6 = arith.constant 0.000000e+00 : f32
    %14 = vector.broadcast %cst_6 : f32 to vector<8x16xf32>
    %15 = arith.select %13, %6, %14 : vector<8x16xi1>, vector<8x16xf32>
    %cst_7 = arith.constant dense<0.000000e+00> : vector<8xf32>
    %16 = vector.multi_reduction <add>, %15, %cst_7 [1] : vector<8x16xf32> to vector<8xf32>
    %17 = vector.shape_cast %16 : vector<8xf32> to vector<8x1xf32>
    %18 = vector.shape_cast %2 : vector<1x16xf32> to vector<1x16xf32>
    %19 = vector.broadcast %18 : vector<1x16xf32> to vector<8x16xf32>
    %cst_8 = arith.constant 0.000000e+00 : f32
    %20 = vector.broadcast %cst_8 : f32 to vector<8x16xf32>
    %21 = arith.select %13, %19, %20 : vector<8x16xi1>, vector<8x16xf32>
    %cst_9 = arith.constant dense<0.000000e+00> : vector<8xf32>
    %22 = vector.multi_reduction <add>, %21, %cst_9 [1] : vector<8x16xf32> to vector<8xf32>
    %23 = vector.shape_cast %22 : vector<8xf32> to vector<8x1xf32>
    %24 = arith.subf %10, %17 : vector<8x1xf32>
    %25 = arith.mulf %23, %24 : vector<8x1xf32>
    %cst_10 = arith.constant 1.600000e+01 : f32
    %26 = vector.broadcast %cst_10 : f32 to vector<8x1xf32>
    %27 = arith.mulf %26, %10 : vector<8x1xf32>
    %cst_11 = arith.constant dense<0.000000e+00> : vector<8xf32>
    %28 = vector.multi_reduction <add>, %6, %cst_11 [1] : vector<8x16xf32> to vector<8xf32>
    %29 = vector.shape_cast %28 : vector<8xf32> to vector<8x1xf32>
    %30 = arith.subf %27, %29 : vector<8x1xf32>
    %31 = arith.divf %25, %30 : vector<8x1xf32>
    %c0_12 = arith.constant 0 : index
    %c0_13 = arith.constant 0 : index
    %32 = vector.load %arg4[%c0_12, %c0_13] : memref<8x1xf32, #tpu.memory_space<vmem>>, vector<8x1xf32>
    tpu.vector_store %arg4[%c0_12, %c0_13], %31 {strides = array<i32>} : memref<8x1xf32, #tpu.memory_space<vmem>>, vector<8x1xf32>,
    return
  }
  func.func @transform_0(%arg0: i32) -> (i32, i32) {
    %c0_i32 = arith.constant 0 : i32
    %c0_i32_0 = arith.constant 0 : i32
    return %arg0, %c0_i32 : i32, i32
  }
  func.func @transform_1(%arg0: i32) -> (i32, i32) {
    %c0_i32 = arith.constant 0 : i32
    %c0_i32_0 = arith.constant 0 : i32
    return %arg0, %c0_i32 : i32, i32
  }
  func.func @transform_2(%arg0: i32) -> (i32, i32) {
    %c0_i32 = arith.constant 0 : i32
    %c0_i32_0 = arith.constant 0 : i32
    %c0_i32_1 = arith.constant 0 : i32
    return %c0_i32, %c0_i32_0 : i32, i32
  }
  func.func @transform_3(%arg0: i32) -> (i32, i32) {
    %c0_i32 = arith.constant 0 : i32
    %c0_i32_0 = arith.constant 0 : i32
    return %arg0, %c0_i32 : i32, i32
  }
}

</mosaic_0001>

<bundles_post_ra>
// kernel: tpu_custom_call.1
= control target key start
LH: loop header
LB: loop body
LE: loop exit
PB: predicated region body
PF: predicated region fallthrough
CT: control target
= control target key end

     0   :  { %vm17_vm0 = vcmask 130048   ;;  %v73_v1 = vmov 0   ;;  %v29_v7 = vlaneseq  ;;  %vm58_vm2 = vcmask 7168   ;;  %s111_s0 = inlined_call_operand.vmem [shape: f32[8,16], index: 0, kind: input, shape index: {}]   ;;  %s112_s1 = inlined_call_operand.vmem [shape: s32[8,1], index: 1, kind: input, shape index: {}]   ;;  %s113_s2 = inlined_call_operand.vmem [shape: f32[1,16], index: 2, kind: input, shape index: {}]   ;;  %s114_s3 = inlined_call_operand.vmem [shape: f32[8,1], index: 3, kind: output, shape index: {}]  }
   0x1   :  { %v14_v0 = vld [vmem:[%s111_s0] sm:$0xff]  ;;  %66 = vset.pattern.permute.xlu0 %v73_v1 }
   0x2   :  { %v18_v2 = vsel %vm17_vm0, %v14_v0, -inf  ;;  %v15_v3 = vld [vmem:[%s112_s1] sm:$0xff]  ;;  %v30_v8 = vand.u32 127, %v29_v7 }
   0x3   :  { %19 = vmax.xlane.f32.xlu0 %v18_v2  ;;  %v64_v13 = vld [vmem:[%s113_s2] ss:$0 sm:$0xff] }
  0x19   :  { %32 = vperm.xlu0 %66, %v15_v3  }
  0x8c   :  { %v20_v4 = vpop.xlane.xlu0 %19 }
  0x8d   :  { %v21_v5 = vsub.f32 %v14_v0, %v20_v4 }
  0x8f   :  { %v22_v6 = vmul.f32 1.442695, %v21_v5  ;;  %v52_v12 = vsel %vm17_vm0, %v21_v5, 0.0 }
  0x91   :  { %67 = vpow2.f32 %v22_v6 }
  0x94   :  { %v33_v10 = vpop.permute.xlu0 %32 }
  0x95   :  { %vm34_vm1 = vcmp.eq.s32.totalorder %v30_v8, %v33_v10 }
  0x96   :  { %v35_v14 = vsel %vm34_vm1, %v21_v5, 0.0  ;;  %v45_v15 = vsel %vm34_vm1, %v64_v13, 0.0 }
  0x97   :  { %v36_v16 = vsel %vm17_vm0, %v35_v14, 0.0  ;;  %v46_v17 = vsel %vm17_vm0, %v45_v15, 0.0 }
  0x9e   :  { %v68_v9 = vpop.eup %67 }
  0x9f   :  { %v24_v11 = vsel %vm17_vm0, %v68_v9, 0.0 }
  0xa0   :  { %25 = vadd.xlane.f32.xlu1 %v24_v11 }
  0xa4   :  { %53 = vadd.xlane.f32.xlu1 %v52_v12 }
  0xa8   :  { %37 = vadd.xlane.f32.xlu1 %v36_v16 }
  0xac   :  { %47 = vadd.xlane.f32.xlu1 %v46_v17 }
 0x129   :  { %v26_v18 = vpop.xlane.xlu1 %25 }
 0x12a   :  { %69 = vlog2.f32 %v26_v18 }
 0x12d   :  { %v54_v22 = vpop.xlane.xlu1 %53 }
 0x131   :  { %v38_v24 = vpop.xlane.xlu1 %37 }
 0x135   :  { %v48_v26 = vpop.xlane.xlu1 %47 }
 0x137   :  { %v70_v19 = vpop.eup %69 }
 0x138   :  { %v28_v20 = vmul.f32 0.6931472, %v70_v19 }
 0x13a   :  { %v51_v21 = vmul.f32 16.0, %v28_v20  ;;  %v49_v25 = vsub.f32 %v28_v20, %v38_v24 }
 0x13c   :  { %v55_v23 = vsub.f32 %v51_v21, %v54_v22  ;;  %v50_v27 = vmul.f32 %v49_v25, %v48_v26 }
 0x13e   :  { %71 = vrcp.f32 %v55_v23 }
 0x14b   :  { %v72_v28 = vpop.eup %71 }
 0x14c   :  { %v57_v29 = vmul.f32 %v72_v28, %v50_v27 }
 0x14e   :  { %59 = vst.msk [vmem:[%s114_s3] sm:$0xff] %vm58_vm2, %v57_v29 }

</bundles_post_ra>
